<compile_context>
chip_gen: v5e
topology: v5e:2x2
jax: 0.10.0
libtpu: 0.0.40
codegen_flags: <defaults>
</compile_context>

<pallas_src>
import jax
import jax.numpy as jnp
from jax.experimental import pallas as pl
from jax.experimental.pallas import tpu as pltpu


def _round_up(x: int, m: int) -> int:
    return ((x + m - 1) // m) * m


def rnu_gate_kernel(x_ref, h_ref, w_ref, u_ref, b_ref, o_ref):
    # In-kernel low-precision cast (activations arrive over a single f32 DMA;
    # nothing is materialized wrapper-side).  Two MXU dots with f32
    # accumulation, f32 bias + sigmoid epilogue, lane-dense store in out dtype.
    w = w_ref[...]
    u = u_ref[...]
    acc = jnp.dot(x_ref[...].astype(w.dtype), w,
                  preferred_element_type=jnp.float32)
    acc = acc + jnp.dot(h_ref[...].astype(u.dtype), u,
                        preferred_element_type=jnp.float32)
    acc = acc + b_ref[...]            # (1, TN) broadcasts over the M tile
    o_ref[...] = jax.nn.sigmoid(acc).astype(o_ref.dtype)


def prepare_rnu_gate_params(W, U, b=None, *, compute_dtype=jnp.bfloat16):
    """One-time parameter packing.  Hoist this out of the per-timestep path."""
    indim, outdim = W.shape
    udim, outdim2 = U.shape
    assert outdim2 == outdim, "W and U must share outdim"

    # Lane-dense output: pad N to a multiple of 128 with zero columns.
    N_pad = _round_up(outdim, 128)
    W_p = jnp.pad(W, ((0, 0), (0, N_pad - outdim))).astype(compute_dtype)
    U_p = jnp.pad(U, ((0, 0), (0, N_pad - outdim))).astype(compute_dtype)

    if b is None:
        b_p = jnp.zeros((1, N_pad), jnp.float32)
    else:
        b2 = jnp.asarray(b, jnp.float32).reshape(1, -1)
        assert b2.shape[1] == outdim, "bias must have outdim elements"
        b_p = jnp.pad(b2, ((0, 0), (0, N_pad - outdim)))

    return {"W": W_p, "U": U_p, "b": b_p, "outdim": outdim}


def rnu_gate_apply(x, h, params, *, out_dtype=jnp.bfloat16, slice_output=True,
                   tm_max=512, tn_max=512, vmem_budget=40 << 20):
    """Apply the gate with pre-packed params (see prepare_rnu_gate_params)."""
    W_p, U_p, b_p, outdim = params["W"], params["U"], params["b"], params["outdim"]
    M, indim = x.shape
    Mh, udim = h.shape
    assert Mh == M
    assert W_p.shape[0] == indim and U_p.shape[0] == udim
    N_pad = W_p.shape[1]

    out_bytes = jnp.dtype(out_dtype).itemsize
    act_bytes = x.dtype.itemsize
    wgt_bytes = W_p.dtype.itemsize

    # --- Tile selection from an explicit VMEM budget (safe on v7x 64 MiB) ---
    TN = min(N_pad, tn_max)
    while N_pad % TN:
        TN -= 128
    TM = min(tm_max, _round_up(M, 16))

    def vmem_need(tm, tn):
        return (2 * tm * (indim + udim) * act_bytes      # x, h (double-buffered)
                + 2 * tm * tn * out_bytes                # output tile
                + 2 * (indim + udim) * tn * wgt_bytes    # W, U blocks
                + 2 * tn * 4)                            # bias

    while vmem_need(TM, TN) > vmem_budget and TM > 16:
        TM = max(16, _round_up(TM // 2, 16))
    while vmem_need(TM, TN) > vmem_budget and TN > 128:
        TN = max(128, TN - 128)
        while N_pad % TN:
            TN -= 128

    M_pad = _round_up(M, TM)
    if M_pad != M:
        x = jnp.pad(x, ((0, M_pad - M), (0, 0)))
        h = jnp.pad(h, ((0, M_pad - M), (0, 0)))
    grid_m = M_pad // TM
    grid_n = N_pad // TN

    cost = pl.CostEstimate(
        flops=2 * M_pad * (indim + udim) * N_pad,
        transcendentals=M_pad * N_pad,
        bytes_accessed=(M_pad * (indim + udim) * act_bytes * grid_n   # x,h per N block
                        + (indim + udim) * N_pad * wgt_bytes          # weights
                        + N_pad * 4                                   # bias
                        + M_pad * N_pad * out_bytes),                 # output
    )

    vmem_limit = min(max(32 << 20, int(vmem_need(TM, TN) * 2)), 48 << 20)

    # Grid = (N blocks, M blocks); M varies fastest so the weight/bias block
    # index is constant across the inner M sweep.
    out = pl.pallas_call(
        rnu_gate_kernel,
        out_shape=jax.ShapeDtypeStruct((M_pad, N_pad), out_dtype),
        grid=(grid_n, grid_m),
        in_specs=[
            pl.BlockSpec((TM, indim), lambda j, i: (i, 0)),   # x stream
            pl.BlockSpec((TM, udim), lambda j, i: (i, 0)),    # h stream
            pl.BlockSpec((indim, TN), lambda j, i: (0, j)),   # W block
            pl.BlockSpec((udim, TN), lambda j, i: (0, j)),    # U block
            pl.BlockSpec((1, TN), lambda j, i: (0, j)),       # bias block
        ],
        out_specs=pl.BlockSpec((TM, TN), lambda j, i: (i, j)),
        compiler_params=pltpu.CompilerParams(
            dimension_semantics=("parallel", "parallel"),
            vmem_limit_bytes=vmem_limit),
        cost_estimate=cost,
    )(x, h, W_p, U_p, b_p)

    if slice_output:
        return out[:M, :outdim]
    return out  # padded (M_pad, N_pad) slab; padding columns are sigmoid(junk) only in cols >= outdim


def rnu_gate(x, h, W, U, b=None, *, compute_dtype=jnp.bfloat16, **kwargs):
    """Convenience one-shot wrapper (prep + apply).  For RNN loops call
    prepare_rnu_gate_params() once and rnu_gate_apply() per step."""
    params = prepare_rnu_gate_params(W, U, b, compute_dtype=compute_dtype)
    return rnu_gate_apply(x, h, params, **kwargs)


def xavier_uniform(key, shape, gain=1.0):
    # Matches torch.nn.init.xavier_uniform_: a = gain * sqrt(6 / (fan_in + fan_out))
    fan_in, fan_out = shape
    a = gain * (6.0 / (fan_in + fan_out)) ** 0.5
    return jax.random.uniform(key, shape, jnp.float32, minval=-a, maxval=a)


if __name__ == "__main__":
    batch, indim, outdim = 16, 32, 64
    udim = outdim  # hdim is None

    key = jax.random.PRNGKey(0)
    k_w, k_u, k_b, k_x, k_h = jax.random.split(key, 5)

    # Deterministic parameter init mirroring reset_parameters()
    # nn.init.calculate_gain('sigmoid') == 1.0
    W = xavier_uniform(k_w, (indim, outdim), gain=1.0)
    U = xavier_uniform(k_u, (udim, outdim), gain=1.0)
    b = jax.random.uniform(k_b, (1, outdim), jnp.float32, minval=-0.01, maxval=0.01)

    x = jax.random.normal(k_x, (batch, indim), jnp.float32)
    h = jax.random.normal(k_h, (batch, udim), jnp.float32)

    # One-time weight prep (hoisted), then apply.
    params = prepare_rnu_gate_params(W, U, b)
    out = rnu_gate_apply(x, h, params)
    out = jax.block_until_ready(out)
    assert out.shape == (batch, outdim)
    assert out.dtype == jnp.bfloat16

    out_f32 = out.astype(jnp.float32)

    # Check against the PyTorch-equivalent full-f32 forward.  bf16 matmul
    # inputs + bf16 output rounding on a sigmoid gate stay well within 1e-2.
    ref_f32 = jax.nn.sigmoid(x @ W + h @ U + b)
    assert jnp.allclose(out_f32, ref_f32, atol=1e-2, rtol=1e-2)

    # Tighter check: reference with the same bf16-cast matmul inputs,
    # f32 accumulate + epilogue, then rounded to bf16 like the kernel store.
    xb = x.astype(jnp.bfloat16).astype(jnp.float32)
    hb = h.astype(jnp.bfloat16).astype(jnp.float32)
    Wb = W.astype(jnp.bfloat16).astype(jnp.float32)
    Ub = U.astype(jnp.bfloat16).astype(jnp.float32)
    ref_bf16_path = jax.nn.sigmoid(xb @ Wb + hb @ Ub + b).astype(jnp.bfloat16)
    assert jnp.allclose(out_f32, ref_bf16_path.astype(jnp.float32),
                        atol=1e-2, rtol=1e-2)

    print("KERNEL_OK")
</pallas_src>

<mosaic_0001>
module attributes {stable_mosaic.version = 11 : i64} {
  func.func @rnu_gate_kernel(%arg0: i32, %arg1: i32, %arg2: memref<16x32xf32, #tpu.memory_space<vmem>>, %arg3: memref<16x64xf32, #tpu.memory_space<vmem>>, %arg4: memref<32x128xbf16, #tpu.memory_space<vmem>>, %arg5: memref<64x128xbf16, #tpu.memory_space<vmem>>, %arg6: memref<1x128xf32, #tpu.memory_space<vmem>>, %arg7: memref<16x128xbf16, #tpu.memory_space<vmem>>) attributes {dimension_semantics = [#tpu.dimension_semantics<parallel>, #tpu.dimension_semantics<parallel>], iteration_bounds = array<i64: 1, 1>, scalar_prefetch = 0 : i64, scratch_operands = 0 : i64, tpu.core_type = #tpu.core_type<tc>, window_params = [{transform_indices = @transform_0, window_bounds = array<i64: 16, 32>}, {transform_indices = @transform_1, window_bounds = array<i64: 16, 64>}, {transform_indices = @transform_2, window_bounds = array<i64: 32, 128>}, {transform_indices = @transform_3, window_bounds = array<i64: 64, 128>}, {transform_indices = @transform_4, window_bounds = array<i64: 1, 128>}, {transform_indices = @transform_5, window_bounds = array<i64: 16, 128>}]} {
    %c0 = arith.constant 0 : index
    %c0_0 = arith.constant 0 : index
    %0 = vector.load %arg4[%c0, %c0_0] : memref<32x128xbf16, #tpu.memory_space<vmem>>, vector<32x128xbf16>
    %c0_1 = arith.constant 0 : index
    %c0_2 = arith.constant 0 : index
    %1 = vector.load %arg5[%c0_1, %c0_2] : memref<64x128xbf16, #tpu.memory_space<vmem>>, vector<64x128xbf16>
    %c0_3 = arith.constant 0 : index
    %c0_4 = arith.constant 0 : index
    %2 = vector.load %arg2[%c0_3, %c0_4] : memref<16x32xf32, #tpu.memory_space<vmem>>, vector<16x32xf32>
    %3 = arith.truncf %2 : vector<16x32xf32> to vector<16x32xbf16>
    %cst = arith.constant dense<0.000000e+00> : vector<16x128xf32>
    %4 = tpu.matmul %3, %0, %cst {dimension_numbers = #tpu.dot_dimension_numbers<[1], [0], [0], [1], [0, 0, 1, 1], [], []>} : vector<16x32xbf16>, vector<32x128xbf16>, vector<16x128xf32> -> vector<16x128xf32>
    %c0_5 = arith.constant 0 : index
    %c0_6 = arith.constant 0 : index
    %5 = vector.load %arg3[%c0_5, %c0_6] : memref<16x64xf32, #tpu.memory_space<vmem>>, vector<16x64xf32>
    %6 = arith.truncf %5 : vector<16x64xf32> to vector<16x64xbf16>
    %cst_7 = arith.constant dense<0.000000e+00> : vector<16x128xf32>
    %7 = tpu.matmul %6, %1, %cst_7 {dimension_numbers = #tpu.dot_dimension_numbers<[1], [0], [0], [1], [0, 0, 1, 1], [], []>} : vector<16x64xbf16>, vector<64x128xbf16>, vector<16x128xf32> -> vector<16x128xf32>
    %8 = arith.addf %4, %7 : vector<16x128xf32>
    %c0_8 = arith.constant 0 : index
    %c0_9 = arith.constant 0 : index
    %9 = vector.load %arg6[%c0_8, %c0_9] : memref<1x128xf32, #tpu.memory_space<vmem>>, vector<1x128xf32>
    %10 = vector.broadcast %9 : vector<1x128xf32> to vector<16x128xf32>
    %11 = arith.addf %8, %10 : vector<16x128xf32>
    %12 = arith.negf %11 : vector<16x128xf32>
    %13 = math.exp %12 : vector<16x128xf32>
    %cst_10 = arith.constant 1.000000e+00 : f32
    %14 = vector.broadcast %cst_10 : f32 to vector<16x128xf32>
    %15 = arith.addf %14, %13 : vector<16x128xf32>
    %16 = arith.divf %14, %15 : vector<16x128xf32>
    %17 = arith.truncf %16 : vector<16x128xf32> to vector<16x128xbf16>
    %c0_11 = arith.constant 0 : index
    %c0_12 = arith.constant 0 : index
    %18 = vector.load %arg7[%c0_11, %c0_12] : memref<16x128xbf16, #tpu.memory_space<vmem>>, vector<16x128xbf16>
    tpu.vector_store %arg7[%c0_11, %c0_12], %17 {strides = array<i32>} : memref<16x128xbf16, #tpu.memory_space<vmem>>, vector<16x128xbf16>,
    return
  }
  func.func @transform_0(%arg0: i32, %arg1: i32) -> (i32, i32) {
    %c0_i32 = arith.constant 0 : i32
    %c0_i32_0 = arith.constant 0 : i32
    return %arg1, %c0_i32 : i32, i32
  }
  func.func @transform_1(%arg0: i32, %arg1: i32) -> (i32, i32) {
    %c0_i32 = arith.constant 0 : i32
    %c0_i32_0 = arith.constant 0 : i32
    return %arg1, %c0_i32 : i32, i32
  }
  func.func @transform_2(%arg0: i32, %arg1: i32) -> (i32, i32) {
    %c0_i32 = arith.constant 0 : i32
    %c0_i32_0 = arith.constant 0 : i32
    return %c0_i32, %arg0 : i32, i32
  }
  func.func @transform_3(%arg0: i32, %arg1: i32) -> (i32, i32) {
    %c0_i32 = arith.constant 0 : i32
    %c0_i32_0 = arith.constant 0 : i32
    return %c0_i32, %arg0 : i32, i32
  }
  func.func @transform_4(%arg0: i32, %arg1: i32) -> (i32, i32) {
    %c0_i32 = arith.constant 0 : i32
    %c0_i32_0 = arith.constant 0 : i32
    return %c0_i32, %arg0 : i32, i32
  }
  func.func @transform_5(%arg0: i32, %arg1: i32) -> (i32, i32) {
    %c0_i32 = arith.constant 0 : i32
    return %arg1, %arg0 : i32, i32
  }
}

</mosaic_0001>

<bundles_post_ra>
// kernel: tpu_custom_call.1
= control target key start
LH: loop header
LB: loop body
LE: loop exit
PB: predicated region body
PF: predicated region fallthrough
CT: control target
= control target key end

     0   :  { %10 = vsyncpa [#allocation3], 0  ;;  %s495_s0 = inlined_call_operand.hbm [shape: f32[16,32], index: 0, kind: input, shape index: {}]   ;;  %s496_s1 = inlined_call_operand.hbm [shape: f32[16,64], index: 1, kind: input, shape index: {}]   ;;  %s497_s2 = inlined_call_operand.hbm [shape: bf16[32,128], index: 2, kind: input, shape index: {}]   ;;  %s498_s3 = inlined_call_operand.hbm [shape: bf16[64,128], index: 3, kind: input, shape index: {}]   ;;  %s499_s4 = inlined_call_operand.vmem [shape: f32[1,128], index: 4, kind: input, shape index: {}]   ;;  %s500_s5 = inlined_call_operand.hbm [shape: bf16[16,128], index: 5, kind: output, shape index: {}]  }
   0x1   :  { %11 = vsyncpa [#allocation6], 0 }
   0x2   :  { %12 = vsyncpa [#allocation9], 0 }
   0x3   :  { %13 = vsyncpa [#allocation4], 0  ;;  %s31_s20 = sshll.u32 %s496_s1, 4  ;;  %s429_s21 = smov [#allocation5]   ;;  %s32_s20 = int_to_ptr.hbm [resolvable:$true] %s31_s20 }
   0x4   :  { %s33_s22 = sshll.u32 %s429_s21, 4  ;;  %s18_s25 = sshll.u32 %s495_s0, 4  ;;  %s34_s22 = int_to_ptr.vmem [resolvable:$true] %s33_s22  ;;  %s19_s25 = int_to_ptr.hbm [resolvable:$true] %s18_s25 }
   0x5   :  { %s430_s26 = smov 128   ;;  %s431_s27 = smov 8  }
   0x6   :  { %39 = dma.hbm_to_vmem [thread:$0]  %s32_s20, 256, %s34_s22, [#allocation6], %s430_s26, %s430_s26, %s431_s27  }
   0x7   :  { %s432_s28 = smov [#allocation2]   ;;  %s44_s7 = sshll.u32 %s497_s2, 4  ;;  %s45_s7 = int_to_ptr.hbm [resolvable:$true] %s44_s7 }
   0x8   :  { %s20_s29 = sshll.u32 %s432_s28, 4  ;;  %s433_s1 = smov [#allocation7]   ;;  %s21_s29 = int_to_ptr.vmem [resolvable:$true] %s20_s29 }
   0x9   :  { %26 = dma.hbm_to_vmem [thread:$0]  %s19_s25, 256, %s21_s29, [#allocation3], %s430_s26, %s430_s26, %s431_s27  }
   0xa   :  { %s46_s8 = sshll.u32 %s433_s1, 4  ;;  %s57_s0 = sshll.u32 %s498_s3, 4  ;;  %s47_s8 = int_to_ptr.vmem [resolvable:$true] %s46_s8  ;;  %s58_s0 = int_to_ptr.hbm [resolvable:$true] %s57_s0 }
   0xb   :  { %s434_s11 = smov 64   ;;  %s435_s12 = smov 4  }
   0xc   :  { %52 = dma.hbm_to_vmem [thread:$0]  %s45_s7, 256, %s47_s8, [#allocation6], %s434_s11, %s434_s11, %s435_s12  }
   0xd   :  { %s436_s13 = smov [#allocation8]  }
   0xe   :  { %s59_s14 = sshll.u32 %s436_s13, 4  ;;  %s60_s14 = int_to_ptr.vmem [resolvable:$true] %s59_s14 }
   0xf   :  { %65 = dma.hbm_to_vmem [thread:$0]  %s58_s0, 512, %s60_s14, [#allocation9], %s434_s11, %s434_s11, %s435_s12  }
  0x10   :  { %421 = dma.done.wait [#allocation3], 256  }
  0x11   :  { %422 = vsyncadd [#allocation3], 4294967040 }
  0x12   :  { %423 = dma.done.wait [#allocation6], 512  }
  0x13   :  { %424 = vsyncadd [#allocation6], 4294966784 }
  0x14   :  { %425 = dma.done.wait [#allocation9], 512  }
  0x15   :  { %426 = vsyncadd [#allocation9], 4294966784  ;;  %v277_v0 = vld [vmem:[#allocation8 + $0x18] sm:$0xff]  ;;  %v276_v2 = vld [vmem:[#allocation8 + $0x10] sm:$0xff]  ;;  %vm157_vm0 = vcmask 261120   ;;  %vm127_vm1 = vcmask 523264  }
  0x16   :  { %v273_v1 = vld [vmem:[#allocation7 + $0x8] sm:$0xff]  ;;  %135 = vmatpush.bf16.msra.mxu0 %v277_v0  ;;  %v272_v3 = vld [vmem:[#allocation7] sm:$0xff]  ;;  %v275_v7 = vld [vmem:[#allocation8 + $0x8] sm:$0xff]  ;;  %s229_s18 = sshll.u32 %s500_s5, 4  ;;  %s230_s18 = int_to_ptr.hbm [resolvable:$true] %s229_s18 }
  0x17   :  { %167 = vmatpush.bf16.msra.mxu1 %v273_v1  ;;  %v97_v4 = vld [vmem:[#allocation2] sm:$0xff]  ;;  %v98_v5 = vld [vmem:[#allocation2 + $0x8] sm:$0xff]  ;;  %v274_v8 = vld [vmem:[#allocation8] sm:$0xff] }
  0x18   :  { %v99_v6 = vpack.c.bf16 %v98_v5, %v97_v4  ;;  %v100_v9 = vld [vmem:[#allocation5] sm:$0xff]  ;;  %v101_v10 = vld [vmem:[#allocation5 + $0x8] sm:$0xff]  ;;  %v292_v13 = vld [vmem:[%s499_s4] ss:$0 sm:$0xff]  ;;  %s437_s4 = smov [#allocation10]  }
  0x19   :  { %v102_v11 = vpack.c.bf16 %v101_v10, %v100_v9  ;;  %s227_s15 = sshll.u32 %s437_s4, 4  ;;  %s228_s15 = int_to_ptr.vmem [resolvable:$true] %s227_s15 }
  0x1a   :  { %136 = vmatpush.bf16.msra.mxu0 %v276_v2 }
  0x1b   :  { %168 = vmatpush.bf16.msra.mxu1 %v272_v3 }
  0x1e   :  { %269 = vmatmul.msk.bf16.vlgmr.msra.gmra.mxu1 %vm157_vm0, %v99_v6  ;;  %137 = vmatpush.bf16.msra.mxu0 %v275_v7 }
  0x22   :  { %138 = vmatpush.bf16.msra.mxu0 %v274_v8 }
  0x25   :  { %260 = vmatmul.msk.bf16.vlgmr.msra.gmra.mxu0 %vm127_vm1, %v102_v11 }
  0x9b   :  { %v170_v12 = vpop.f32.mrf.mxu1 }
  0xa2   :  { %v140_v14 = vpop.f32.mrf.mxu0 }
  0xa3   :  { %v171_v15 = vadd.f32 %v170_v12, %v140_v14  ;;  %v172_v18 = vpop.f32.mrf.mxu1 }
  0xa5   :  { %v179_v16 = vadd.f32 %v292_v13, %v171_v15 }
  0xa7   :  { %v270_v17 = vmul.f32 -1.442695, %v179_v16 }
  0xa9   :  { %293 = vpow2.f32 %v270_v17 }
  0xaa   :  { %v142_v19 = vpop.f32.mrf.mxu0 }
  0xab   :  { %v173_v20 = vadd.f32 %v172_v18, %v142_v19 }
  0xad   :  { %v180_v21 = vadd.f32 %v292_v13, %v173_v20 }
  0xaf   :  { %v294_v22 = vpop.eup %293  ;;  %v271_v23 = vmul.f32 -1.442695, %v180_v21 }
  0xb0   :  { %v187_v24 = vadd.f32 1.0, %v294_v22 }
  0xb1   :  { %295 = vpow2.f32 %v271_v23 }
  0xb2   :  { %297 = vrcp.f32 %v187_v24  ;;  %vm194_vm3 = vweird.f32 %v187_v24  ;;  %v200_v35 = vand.u32 2147483648, %v187_v24  ;;  %v198_v37 = vand.u32 2147483647, %v187_v24 }
  0xb4   :  { %v201_v42 = vor.u32 1.1754944e-38, %v200_v35  ;;  %vm199_vm8 = vcmp.eq.f32.partialorder %v198_v37, 8.507059e+37 }
  0xb7   :  { %v296_v25 = vpop.eup %295 }
  0xb8   :  { %v298_v26 = vpop.eup %297  ;;  %v188_v27 = vadd.f32 1.0, %v296_v25 }
  0xb9   :  { %v190_v28 = vmul.f32 %v298_v26, %v187_v24  ;;  %vm195_vm2 = vweird.f32 %v298_v26 }
  0xba   :  { %299 = vrcp.f32 %v188_v27  ;;  %v215_v36 = vand.u32 2147483648, %v188_v27  ;;  %v213_v39 = vand.u32 2147483647, %v188_v27  ;;  %vm196_vm5 = vmor %vm194_vm3, %vm195_vm2  ;;  %vm209_vm6 = vweird.f32 %v188_v27 }
  0xbb   :  { %v191_v29 = vsub.f32 1.0, %v190_v28 }
  0xbc   :  { %v216_v43 = vor.u32 1.1754944e-38, %v215_v36  ;;  %vm214_vm9 = vcmp.eq.f32.partialorder %v213_v39, 8.507059e+37 }
  0xbd   :  { %v192_v30 = vmul.f32 %v298_v26, %v191_v29 }
  0xbf   :  { %v193_v33 = vadd.f32 %v298_v26, %v192_v30 }
  0xc0   :  { %v300_v31 = vpop.eup %299 }
  0xc1   :  { %v205_v32 = vmul.f32 %v300_v31, %v188_v27  ;;  %vm210_vm4 = vweird.f32 %v300_v31  ;;  %v197_v40 = vsel %vm196_vm5, %v298_v26, %v193_v33 }
  0xc2   :  { %vm211_vm7 = vmor %vm209_vm6, %vm210_vm4  ;;  %v202_v45 = vsel %vm199_vm8, %v201_v42, %v197_v40 }
  0xc3   :  { %v206_v34 = vsub.f32 1.0, %v205_v32 }
  0xc5   :  { %v207_v38 = vmul.f32 %v300_v31, %v206_v34 }
  0xc7   :  { %v208_v41 = vadd.f32 %v300_v31, %v207_v38 }
  0xc9   :  { %v212_v44 = vsel %vm211_vm7, %v300_v31, %v208_v41 }
  0xca   :  { %v217_v46 = vsel %vm214_vm9, %v216_v43, %v212_v44 }
  0xcb   :  { %v281_v47 = vpack.c.bf16 %v217_v46, %v202_v45 }
  0xcd   :  { %282 = vst [vmem:[#allocation10] sm:$0xff] %v281_v47  }
  0xce   :  { %235 = dma.vmem_to_hbm [thread:$0]  %s228_s15, 128, %s230_s18, [#allocation4], %s434_s11, %s434_s11, %s435_s12  }
  0xcf   :  { %427 = dma.done.wait [#allocation4], 128  }
  0xd0   :  { %428 = vsyncadd [#allocation4], 4294967168 }
  0xd1   :  { %240 = vsyncpa [#allocation3], 1 }
  0xd2   :  { %241 = vsyncpa [#allocation6], 1 }
  0xd3   :  { %242 = vsyncpa [#allocation9], 1 }
  0xd4   :  { %243 = vsyncpa [#allocation4], 1 }

</bundles_post_ra>
